<compile_context>
chip_gen: v6e
topology: v6e:2x2x1
jax: 0.10.0
libtpu: 0.0.40
codegen_flags: <defaults>
</compile_context>

<pallas_src>
import jax
import jax.numpy as jnp
from jax import lax
from jax.experimental import pallas as pl
from jax.experimental.pallas import tpu as pltpu

_NORM_EPS = 1e-12


def _project_normalize_kernel(x_ref, w_ref, b_ref, out_ref):
    """out = normalize(x @ W + b) along the last dim, stored in out_ref.dtype."""
    k = jnp.dot(x_ref[...].astype(jnp.bfloat16),
                w_ref[...].astype(jnp.bfloat16),
                preferred_element_type=jnp.float32) + b_ref[...]
    k_hat = k * lax.rsqrt(jnp.sum(k * k, axis=-1, keepdims=True) + _NORM_EPS)
    out_ref[...] = k_hat.astype(out_ref.dtype)


def _attn_kernel(x_blk_ref, wq_ref, bq_ref, khat_t_ref, out_ref):
    # q projection for this row block: bf16 MXU operands, f32 accumulation.
    q = jnp.dot(x_blk_ref[...].astype(jnp.bfloat16),
                wq_ref[...].astype(jnp.bfloat16),
                preferred_element_type=jnp.float32) + bq_ref[...]
    q_hat = q * lax.rsqrt(jnp.sum(q * q, axis=-1, keepdims=True) + _NORM_EPS)

    # scores = q_hat @ k_hat^T as a plain NN matmul (k_hat was transposed once
    # in the wrapper, so no XLU transpose inside the kernel).
    scores = jnp.dot(q_hat.astype(jnp.bfloat16), khat_t_ref[...],
                     preferred_element_type=jnp.float32)          # (TM, N)

    # Cosine scores lie in [-1, 1] so exp is safe without max-subtraction.
    e = jnp.exp(scores)
    denom = jnp.sum(e, axis=-1, keepdims=True)
    # Exact division so every output row sums to 1 to f32 precision.
    out_ref[...] = (e / denom).astype(out_ref.dtype)


def _pick_row_block(n, target):
    """Largest row-block size <= target that is a multiple of 8 and divides n."""
    if n % 8 != 0 or n <= 8:
        return n  # full-extent block is always legal
    tm = min(target, n)
    tm -= tm % 8
    tm = max(tm, 8)
    while n % tm != 0:
        tm -= 8
    return tm


def attn_model_forward(x, wq, bq, wk, bk, *, block_rows=256):
    """x: (N, emb_dim); wq/wk: (emb_dim, attn_dim); bq/bk: (1, attn_dim)."""
    n, emb = x.shape
    attn = wq.shape[1]
    tm = _pick_row_block(n, block_rows)
    grid = (n // tm,)

    # 32 MiB is >= the default scoped limit on every generation and fits the
    # demo tiles easily; re-derive TM / the limit for large N (esp. v7x 64 MiB).
    cparams = pltpu.CompilerParams(
        dimension_semantics=("parallel",),
        vmem_limit_bytes=32 * 1024 * 1024)

    # --- One-shot key projection: k_hat = normalize(x @ Wk + bk), bf16. ---
    k_hat = pl.pallas_call(
        _project_normalize_kernel,
        out_shape=jax.ShapeDtypeStruct((n, attn), jnp.bfloat16),
        grid=grid,
        in_specs=[
            pl.BlockSpec((tm, emb), lambda i: (i, 0)),
            pl.BlockSpec((emb, attn), lambda i: (0, 0)),
            pl.BlockSpec((1, attn), lambda i: (0, 0)),
        ],
        out_specs=pl.BlockSpec((tm, attn), lambda i: (i, 0)),
        compiler_params=cparams,
    )(x, wk, bk)

    # Transpose once in the wrapper (tiny, done by XLA) so the main kernel's
    # score matmul is NN and the key slab stays bf16 and VMEM-resident.
    k_hat_t = k_hat.T  # (attn, n), bf16

    # --- Main attention kernel, row-block grid. ---
    return pl.pallas_call(
        _attn_kernel,
        out_shape=jax.ShapeDtypeStruct((n, n), jnp.float32),
        grid=grid,
        in_specs=[
            pl.BlockSpec((tm, emb), lambda i: (i, 0)),     # x rows -> q block
            pl.BlockSpec((emb, attn), lambda i: (0, 0)),   # Wq (constant)
            pl.BlockSpec((1, attn), lambda i: (0, 0)),     # bq (constant)
            pl.BlockSpec((attn, n), lambda i: (0, 0)),     # k_hat^T (constant)
        ],
        out_specs=pl.BlockSpec((tm, n), lambda i: (i, 0)),
        compiler_params=cparams,
    )(x, wq, bq, k_hat_t)


def _reference(x, wq, bq, wk, bk):
    q = x @ wq + bq
    k = x @ wk + bk
    qn = jnp.linalg.norm(q, axis=-1, keepdims=True)
    kn = jnp.linalg.norm(k, axis=-1, keepdims=True)
    scores = (q @ k.T) / (qn * kn.T)
    return jax.nn.softmax(scores, axis=-1)


if __name__ == "__main__":
    # Module defaults: emb_dim=128, attn_dim=128. Small demo sequence N=128;
    # per the review, the small-N path uses a single grid step (block_rows>=N).
    N, EMB, ATTN = 128, 128, 128

    key = jax.random.PRNGKey(0)
    kx, kwq, kbq, kwk, kbk = jax.random.split(key, 5)

    # nn.Linear default init: U(-1/sqrt(fan_in), 1/sqrt(fan_in)) — deterministic mimic.
    bound = 1.0 / (EMB ** 0.5)
    x = jax.random.normal(kx, (N, EMB), dtype=jnp.float32)
    wq = jax.random.uniform(kwq, (EMB, ATTN), minval=-bound, maxval=bound, dtype=jnp.float32)
    bq = jax.random.uniform(kbq, (1, ATTN), minval=-bound, maxval=bound, dtype=jnp.float32)
    wk = jax.random.uniform(kwk, (EMB, ATTN), minval=-bound, maxval=bound, dtype=jnp.float32)
    bk = jax.random.uniform(kbk, (1, ATTN), minval=-bound, maxval=bound, dtype=jnp.float32)

    out = attn_model_forward(x, wq, bq, wk, bk, block_rows=256)  # single grid step
    out = jax.block_until_ready(out)

    ref = _reference(x, wq, bq, wk, bk)
    assert out.shape == (N, N)
    # Tolerance budget for the bf16 MXU operands (f32 accumulation) vs. the
    # pure-f32 reference.
    assert jnp.allclose(out, ref, atol=2e-3, rtol=2e-2), "mismatch vs JAX reference"
    # Exact softmax denominator -> rows sum to 1 to f32 precision.
    assert jnp.allclose(jnp.sum(out, axis=-1), 1.0, atol=1e-3), "rows must sum to 1"

    print("KERNEL_OK")
</pallas_src>

<mosaic_0001>
module attributes {stable_mosaic.version = 11 : i64} {
  func.func @_project_normalize_kernel(%arg0: i32, %arg1: memref<128x128xf32, #tpu.memory_space<vmem>>, %arg2: memref<128x128xf32, #tpu.memory_space<vmem>>, %arg3: memref<1x128xf32, #tpu.memory_space<vmem>>, %arg4: memref<128x128xbf16, #tpu.memory_space<vmem>>) attributes {dimension_semantics = [#tpu.dimension_semantics<parallel>], iteration_bounds = array<i64: 1>, scalar_prefetch = 0 : i64, scratch_operands = 0 : i64, tpu.core_type = #tpu.core_type<tc>, window_params = [{transform_indices = @transform_0, window_bounds = array<i64: 128, 128>}, {pipeline_mode = #tpu.pipeline_mode<synchronous>, transform_indices = @transform_1, window_bounds = array<i64: 128, 128>}, {pipeline_mode = #tpu.pipeline_mode<synchronous>, transform_indices = @transform_2, window_bounds = array<i64: 1, 128>}, {transform_indices = @transform_3, window_bounds = array<i64: 128, 128>}]} {
    %c0 = arith.constant 0 : index
    %c0_0 = arith.constant 0 : index
    %0 = vector.load %arg1[%c0, %c0_0] : memref<128x128xf32, #tpu.memory_space<vmem>>, vector<128x128xf32>
    %1 = arith.truncf %0 : vector<128x128xf32> to vector<128x128xbf16>
    %c0_1 = arith.constant 0 : index
    %c0_2 = arith.constant 0 : index
    %2 = vector.load %arg2[%c0_1, %c0_2] : memref<128x128xf32, #tpu.memory_space<vmem>>, vector<128x128xf32>
    %3 = arith.truncf %2 : vector<128x128xf32> to vector<128x128xbf16>
    %cst = arith.constant dense<0.000000e+00> : vector<128x128xf32>
    %4 = tpu.matmul %1, %3, %cst {dimension_numbers = #tpu.dot_dimension_numbers<[1], [0], [0], [1], [0, 0, 1, 1], [], []>} : vector<128x128xbf16>, vector<128x128xbf16>, vector<128x128xf32> -> vector<128x128xf32>
    %c0_3 = arith.constant 0 : index
    %c0_4 = arith.constant 0 : index
    %5 = vector.load %arg3[%c0_3, %c0_4] : memref<1x128xf32, #tpu.memory_space<vmem>>, vector<1x128xf32>
    %6 = vector.broadcast %5 : vector<1x128xf32> to vector<128x128xf32>
    %7 = arith.addf %4, %6 : vector<128x128xf32>
    %8 = arith.mulf %7, %7 : vector<128x128xf32>
    %cst_5 = arith.constant dense<0.000000e+00> : vector<128xf32>
    %9 = vector.multi_reduction <add>, %8, %cst_5 [1] : vector<128x128xf32> to vector<128xf32>
    %10 = vector.shape_cast %9 : vector<128xf32> to vector<128x1xf32>
    %cst_6 = arith.constant 9.99999996E-13 : f32
    %11 = vector.broadcast %cst_6 : f32 to vector<128x1xf32>
    %12 = arith.addf %10, %11 : vector<128x1xf32>
    %13 = math.rsqrt %12 : vector<128x1xf32>
    %14 = vector.broadcast %13 : vector<128x1xf32> to vector<128x128xf32>
    %15 = arith.mulf %7, %14 : vector<128x128xf32>
    %16 = arith.truncf %15 : vector<128x128xf32> to vector<128x128xbf16>
    %c0_7 = arith.constant 0 : index
    %c0_8 = arith.constant 0 : index
    %17 = vector.load %arg4[%c0_7, %c0_8] : memref<128x128xbf16, #tpu.memory_space<vmem>>, vector<128x128xbf16>
    tpu.vector_store %arg4[%c0_7, %c0_8], %16 {strides = array<i32>} : memref<128x128xbf16, #tpu.memory_space<vmem>>, vector<128x128xbf16>,
    return
  }
  func.func @transform_0(%arg0: i32) -> (i32, i32) {
    %c0_i32 = arith.constant 0 : i32
    %c0_i32_0 = arith.constant 0 : i32
    return %arg0, %c0_i32 : i32, i32
  }
  func.func @transform_1(%arg0: i32) -> (i32, i32) {
    %c0_i32 = arith.constant 0 : i32
    %c0_i32_0 = arith.constant 0 : i32
    %c0_i32_1 = arith.constant 0 : i32
    return %c0_i32, %c0_i32_0 : i32, i32
  }
  func.func @transform_2(%arg0: i32) -> (i32, i32) {
    %c0_i32 = arith.constant 0 : i32
    %c0_i32_0 = arith.constant 0 : i32
    %c0_i32_1 = arith.constant 0 : i32
    return %c0_i32, %c0_i32_0 : i32, i32
  }
  func.func @transform_3(%arg0: i32) -> (i32, i32) {
    %c0_i32 = arith.constant 0 : i32
    %c0_i32_0 = arith.constant 0 : i32
    return %arg0, %c0_i32 : i32, i32
  }
}

</mosaic_0001>

<bundles_post_ra>
// kernel: tpu_custom_call.1
= control target key start
LH: loop header
LB: loop body
LE: loop exit
PB: predicated region body
PF: predicated region fallthrough
CT: control target
= control target key end

     0   :  { %8 = vsyncpa [#allocation3], 0  ;;  %s758_s0 = inlined_call_operand.hbm [shape: f32[128,128], index: 0, kind: input, shape index: {}]   ;;  %s759_s1 = inlined_call_operand.hbm [shape: f32[128,128], index: 1, kind: input, shape index: {}]   ;;  %s760_s2 = inlined_call_operand.vmem [shape: f32[1,128], index: 2, kind: input, shape index: {}]   ;;  %s761_s3 = inlined_call_operand.hbm [shape: bf16[128,128], index: 3, kind: output, shape index: {}]  }
   0x1   :  { %9 = vsyncpa [#allocation6], 0 }
   0x2   :  { %10 = vsyncpa [#allocation4], 0  ;;  %s639_s12 = smov [#allocation2]  }
   0x3   :  { %s16_s13 = sshll.u32 %s639_s12, 4  ;;  %s17_s13 = int_to_ptr.vmem [resolvable:$true] %s16_s13 }
   0x4   :  { %s581_s14 = scalar_lea.vmem %s17_s13, 2048  ;;  %p586_p1 = scmp.lt.s32.totalorder %s17_s13, %s17_s13 }
   0x5   :  { %p582_p0 = scmp.ne.s32.totalorder %s17_s13, %s581_s14  ;;  %p587_p2 = scmp.lt.s32.totalorder %s581_s14, %s581_s14 }
   0x7   :  { %p588_p3 = por %p587_p2, %p586_p1 }
   0x9   :  { %p589_p4 = pnand %p588_p3, %p582_p0 }
   0xb   :  { %592 = shalt.err (!%p589_p4)
}
   0xc   :  { %s640_s15 = smov 128   ;;  %s641_s16 = smov 8  }
   0xd   :  { %22 = dma.hbm_to_vmem [thread:$0]  %s758_s0, 2048, %s17_s13, [#allocation3], %s640_s15, %s640_s15, %s641_s16  }
   0xe   :  { %s642_s19 = smov [#allocation5]  }
   0xf   :  { %s28_s20 = sshll.u32 %s642_s19, 4  ;;  %s29_s20 = int_to_ptr.vmem [resolvable:$true] %s28_s20 }
  0x10   :  { %s601_s21 = scalar_lea.vmem %s29_s20, 2048  ;;  %p606_p6 = scmp.lt.s32.totalorder %s29_s20, %s29_s20 }
  0x11   :  { %p602_p5 = scmp.ne.s32.totalorder %s29_s20, %s601_s21  ;;  %p607_p7 = scmp.lt.s32.totalorder %s601_s21, %s601_s21 }
  0x13   :  { %p608_p8 = por %p607_p7, %p606_p6 }
  0x15   :  { %p609_p9 = pnand %p608_p8, %p602_p5 }
  0x17   :  { %612 = shalt.err (!%p609_p9)
}
  0x18   :  { %34 = dma.hbm_to_vmem [thread:$0]  %s759_s1, 2048, %s29_s20, [#allocation6], %s640_s15, %s640_s15, %s641_s16  }
  0x19   :  { %633 = dma.done.wait [#allocation3], 2048  }
  0x1a   :  { %634 = vsyncadd [#allocation3], 4294965248 }
  0x1b   :  { %635 = dma.done.wait [#allocation6], 2048  }
  0x1c   :  { %636 = vsyncadd [#allocation6], 4294965248  ;;  %v82_v0 = vld [vmem:[#allocation5 + $0x70] sm:$0xff]  ;;  %v83_v1 = vld [vmem:[#allocation5 + $0x78] sm:$0xff] }
  0x1d   :  { %v80_v2 = vld [vmem:[#allocation5 + $0x60] sm:$0xff]  ;;  %v91_v3 = vpack.c.bf16 %v83_v1, %v82_v0  ;;  %v81_v4 = vld [vmem:[#allocation5 + $0x68] sm:$0xff]  ;;  %v78_v6 = vld [vmem:[#allocation5 + $0x50] sm:$0xff] }
  0x1e   :  { %v90_v5 = vpack.c.bf16 %v81_v4, %v80_v2  ;;  %v79_v7 = vld [vmem:[#allocation5 + $0x58] sm:$0xff]  ;;  %v76_v9 = vld [vmem:[#allocation5 + $0x40] sm:$0xff]  ;;  %v45_v11 = vld [vmem:[#allocation2 + $0x8] sm:$0xff] }
  0x1f   :  { %486 = vmatprep.subr.bf16.mxu0 %v91_v3  ;;  %518 = vmatprep.subr.bf16.mxu1 %v91_v3  ;;  %v89_v8 = vpack.c.bf16 %v79_v7, %v78_v6  ;;  %v44_v10 = vld [vmem:[#allocation2] sm:$0xff]  ;;  %v77_v12 = vld [vmem:[#allocation5 + $0x48] sm:$0xff]  ;;  %v74_v18 = vld [vmem:[#allocation5 + $0x30] sm:$0xff] }
  0x20   :  { %487 = vmatpush3.bf16.msra.mxu0 %v91_v3  ;;  %526 = vmatpush3.bf16.msra.mxu1 %v91_v3  ;;  %v60_v13 = vpack.c.bf16 %v45_v11, %v44_v10  ;;  %v52_v14 = vld [vmem:[#allocation2 + $0x40] sm:$0xff]  ;;  %v53_v15 = vld [vmem:[#allocation2 + $0x48] sm:$0xff]  ;;  %v88_v17 = vpack.c.bf16 %v77_v12, %v76_v9  ;;  %v75_v19 = vld [vmem:[#allocation5 + $0x38] sm:$0xff] }
  0x21   :  { %488 = vmatprep.subr.bf16.mxu0 %v90_v5  ;;  %519 = vmatprep.subr.bf16.mxu1 %v90_v5  ;;  %v64_v16 = vpack.c.bf16 %v53_v15, %v52_v14  ;;  %v87_v20 = vpack.c.bf16 %v75_v19, %v74_v18  ;;  %v72_v21 = vld [vmem:[#allocation5 + $0x20] sm:$0xff]  ;;  %v73_v22 = vld [vmem:[#allocation5 + $0x28] sm:$0xff]  ;;  %v70_v24 = vld [vmem:[#allocation5 + $0x10] sm:$0xff] }
  0x22   :  { %502 = vmatprep.mubr.bf16.mxu0 %v60_v13  ;;  %v86_v23 = vpack.c.bf16 %v73_v22, %v72_v21  ;;  %v71_v25 = vld [vmem:[#allocation5 + $0x18] sm:$0xff]  ;;  %v68_v27 = vld [vmem:[#allocation5] sm:$0xff]  ;;  %v69_v28 = vld [vmem:[#allocation5 + $0x8] sm:$0xff] }
  0x23   :  { %510 = vmatprep.mubr.bf16.mxu1 %v64_v16  ;;  %v85_v26 = vpack.c.bf16 %v71_v25, %v70_v24  ;;  %v84_v29 = vpack.c.bf16 %v69_v28, %v68_v27  ;;  %v46_v30 = vld [vmem:[#allocation2 + $0x10] sm:$0xff]  ;;  %v47_v31 = vld [vmem:[#allocation2 + $0x18] sm:$0xff]  ;;  %v48_v34 = vld [vmem:[#allocation2 + $0x20] sm:$0xff] }
  0x24   :  { %489 = vmatpush3.bf16.msra.mxu0 %v90_v5  ;;  %527 = vmatpush3.bf16.msra.mxu1 %v90_v5  ;;  %v54_v32 = vld [vmem:[#allocation2 + $0x50] sm:$0xff]  ;;  %v55_v33 = vld [vmem:[#allocation2 + $0x58] sm:$0xff]  ;;  %v49_v35 = vld [vmem:[#allocation2 + $0x28] sm:$0xff]  ;;  %v61_v38 = vpack.c.bf16 %v47_v31, %v46_v30 }
  0x25   :  { %490 = vmatprep.subr.bf16.mxu0 %v89_v8  ;;  %520 = vmatprep.subr.bf16.mxu1 %v89_v8  ;;  %v56_v36 = vld [vmem:[#allocation2 + $0x60] sm:$0xff]  ;;  %v57_v37 = vld [vmem:[#allocation2 + $0x68] sm:$0xff]  ;;  %v65_v39 = vpack.c.bf16 %v55_v33, %v54_v32  ;;  %v62_v40 = vpack.c.bf16 %v49_v35, %v48_v34  ;;  %v50_v42 = vld [vmem:[#allocation2 + $0x30] sm:$0xff] }
  0x26   :  { %v66_v41 = vpack.c.bf16 %v57_v37, %v56_v36  ;;  %v51_v43 = vld [vmem:[#allocation2 + $0x38] sm:$0xff]  ;;  %v58_v44 = vld [vmem:[#allocation2 + $0x70] sm:$0xff]  ;;  %v390_v48 = vld [vmem:[%s760_s2] ss:$0 sm:$0xff]  ;;  %s643_s2 = smov [#allocation7]  }
  0x27   :  { %v59_v45 = vld [vmem:[#allocation2 + $0x78] sm:$0xff]  ;;  %v63_v46 = vpack.c.bf16 %v51_v43, %v50_v42  ;;  %s377_s24 = sshll.u32 %s643_s2, 4  ;;  %s378_s24 = int_to_ptr.vmem [resolvable:$true] %s377_s24 }
  0x28   :  { %491 = vmatpush3.bf16.msra.mxu0 %v89_v8  ;;  %528 = vmatpush3.bf16.msra.mxu1 %v89_v8  ;;  %v67_v47 = vpack.c.bf16 %v59_v45, %v58_v44  ;;  %s613_s25 = scalar_lea.vmem %s378_s24, 1024  ;;  %p618_p11 = scmp.lt.s32.totalorder %s378_s24, %s378_s24 }
  0x29   :  { %492 = vmatprep.subr.bf16.mxu0 %v88_v17  ;;  %521 = vmatprep.subr.bf16.mxu1 %v88_v17  ;;  %p614_p10 = scmp.ne.s32.totalorder %s378_s24, %s613_s25  ;;  %p619_p12 = scmp.lt.s32.totalorder %s613_s25, %s613_s25 }
  0x2b   :  { %p620_p13 = por %p619_p12, %p618_p11 }
  0x2c   :  { %493 = vmatpush3.bf16.msra.mxu0 %v88_v17  ;;  %529 = vmatpush3.bf16.msra.mxu1 %v88_v17 }
  0x2d   :  { %494 = vmatprep.subr.bf16.mxu0 %v87_v20  ;;  %522 = vmatprep.subr.bf16.mxu1 %v87_v20  ;;  %p621_p0 = pnand %p620_p13, %p614_p10 }
  0x30   :  { %495 = vmatpush3.bf16.msra.mxu0 %v87_v20  ;;  %530 = vmatpush3.bf16.msra.mxu1 %v87_v20 }
  0x31   :  { %496 = vmatprep.subr.bf16.mxu0 %v86_v23  ;;  %523 = vmatprep.subr.bf16.mxu1 %v86_v23 }
  0x34   :  { %497 = vmatpush3.bf16.msra.mxu0 %v86_v23  ;;  %531 = vmatpush3.bf16.msra.mxu1 %v86_v23 }
  0x35   :  { %498 = vmatprep.subr.bf16.mxu0 %v85_v26  ;;  %524 = vmatprep.subr.bf16.mxu1 %v85_v26 }
  0x38   :  { %499 = vmatpush3.bf16.msra.mxu0 %v85_v26  ;;  %532 = vmatpush3.bf16.msra.mxu1 %v85_v26 }
  0x39   :  { %500 = vmatprep.subr.bf16.mxu0 %v84_v29  ;;  %525 = vmatprep.subr.bf16.mxu1 %v84_v29 }
  0x3c   :  { %501 = vmatpush3.bf16.msra.mxu0 %v84_v29  ;;  %533 = vmatpush3.bf16.msra.mxu1 %v84_v29 }
  0x3f   :  { %503 = vmatmul.mubr.bf16.vlgmr.msra.gmra.mxu0 %v61_v38  ;;  %511 = vmatmul.mubr.bf16.vlgmr.msra.gmra.mxu1 %v65_v39 }
  0x40   :  { %506 = vmatprep.mubr.bf16.mxu0 %v62_v40  ;;  %514 = vmatprep.mubr.bf16.mxu1 %v66_v41 }
  0x47   :  { %507 = vmatmul.mubr.bf16.gmra.mxu0 %v63_v46  ;;  %515 = vmatmul.mubr.bf16.gmra.mxu1 %v67_v47 }
  0xff   :  { %v504_v49 = vpop.f32.mrf.mxu0  ;;  %v512_v50 = vpop.f32.mrf.mxu1 }
 0x100   :  { %v675_v51 = vadd.f32 %v504_v49, %v390_v48  ;;  %v677_v52 = vadd.f32 %v512_v50, %v390_v48 }
 0x101   :  { %v133_v53 = vpop.f32.mrf.mxu0  ;;  %v165_v54 = vpop.f32.mrf.mxu1 }
 0x102   :  { %v679_v55 = vadd.f32 %v390_v48, %v133_v53  ;;  %v206_v56 = vmul.f32 %v677_v52, %v677_v52  ;;  %v198_v57 = vmul.f32 %v675_v51, %v675_v51  ;;  %v687_v63 = vadd.f32 %v390_v48, %v165_v54 }
 0x103   :  { %v505_v58 = vpop.f32.mrf.mxu0  ;;  %v513_v59 = vpop.f32.mrf.mxu1 }
 0x104   :  { %v685_v60 = vadd.f32 %v505_v58, %v390_v48  ;;  %232 = vadd.xlane.f32.xlu0 %v206_v56  ;;  %216 = vadd.xlane.f32.xlu1 %v198_v57  ;;  %v689_v0 = vadd.f32 %v513_v59, %v390_v48  ;;  %v196_v2 = vmul.f32 %v679_v55, %v679_v55 }
 0x105   :  { %v136_v61 = vpop.f32.mrf.mxu0  ;;  %v168_v62 = vpop.f32.mrf.mxu1  ;;  %v204_v9 = vmul.f32 %v687_v63, %v687_v63 }
 0x106   :  { %v199_v1 = vmul.f32 %v685_v60, %v685_v60  ;;  %v695_v6 = vadd.f32 %v390_v48, %v136_v61  ;;  %v697_v7 = vadd.f32 %v390_v48, %v168_v62  ;;  %v207_v8 = vmul.f32 %v689_v0, %v689_v0 }
 0x107   :  { %v508_v3 = vpop.f32.mrf.mxu0  ;;  %v516_v4 = vpop.f32.mrf.mxu1 }
 0x108   :  { %218 = vadd.xlane.f32.xlu1 %v199_v1  ;;  %212 = vadd.xlane.f32.xlu0 %v196_v2  ;;  %v703_v12 = vadd.f32 %v508_v3, %v390_v48  ;;  %v205_v14 = vmul.f32 %v697_v7, %v697_v7  ;;  %v197_v15 = vmul.f32 %v695_v6, %v695_v6 }
 0x109   :  { %v149_v5 = vpop.f32.mrf.mxu0  ;;  %v181_v11 = vpop.f32.mrf.mxu1  ;;  %v727_v27 = vadd.f32 %v516_v4, %v390_v48 }
 0x10a   :  { %v711_v18 = vadd.f32 %v390_v48, %v149_v5  ;;  %v202_v21 = vmul.f32 %v703_v12, %v703_v12  ;;  %v719_v23 = vadd.f32 %v390_v48, %v181_v11 }
 0x10b   :  { %v509_v10 = vpop.f32.mrf.mxu0  ;;  %v517_v17 = vpop.f32.mrf.mxu1  ;;  %v210_v32 = vmul.f32 %v727_v27, %v727_v27 }
 0x10c   :  { %234 = vadd.xlane.f32.xlu1 %v207_v8  ;;  %228 = vadd.xlane.f32.xlu0 %v204_v9  ;;  %v705_v13 = vadd.f32 %v509_v10, %v390_v48  ;;  %v200_v26 = vmul.f32 %v711_v18, %v711_v18  ;;  %v729_v28 = vadd.f32 %v517_v17, %v390_v48 }
 0x10d   :  { %v152_v16 = vpop.f32.mrf.mxu0  ;;  %v184_v22 = vpop.f32.mrf.mxu1  ;;  %v208_v30 = vmul.f32 %v719_v23, %v719_v23 }
 0x10e   :  { %v713_v19 = vadd.f32 %v390_v48, %v152_v16  ;;  %v203_v20 = vmul.f32 %v705_v13, %v705_v13  ;;  %v721_v24 = vadd.f32 %v390_v48, %v184_v22  ;;  %v211_v31 = vmul.f32 %v729_v28, %v729_v28 }
 0x110   :  { %230 = vadd.xlane.f32.xlu1 %v205_v14  ;;  %214 = vadd.xlane.f32.xlu0 %v197_v15  ;;  %v201_v25 = vmul.f32 %v713_v19, %v713_v19  ;;  %v209_v29 = vmul.f32 %v721_v24, %v721_v24 }
 0x114   :  { %226 = vadd.xlane.f32.xlu1 %v203_v20  ;;  %224 = vadd.xlane.f32.xlu0 %v202_v21 }
 0x118   :  { %222 = vadd.xlane.f32.xlu1 %v201_v25  ;;  %220 = vadd.xlane.f32.xlu0 %v200_v26 }
 0x11c   :  { %238 = vadd.xlane.f32.xlu1 %v209_v29  ;;  %236 = vadd.xlane.f32.xlu0 %v208_v30 }
 0x120   :  { %242 = vadd.xlane.f32.xlu1 %v211_v31  ;;  %240 = vadd.xlane.f32.xlu0 %v210_v32 }
 0x18d   :  { %v233_v33 = vpop.xlane.xlu0 %232  ;;  %v217_v34 = vpop.xlane.xlu1 %216 }
 0x18e   :  { %v246_v35 = vadd.f32 1e-12, %v217_v34  ;;  %v254_v38 = vadd.f32 1e-12, %v233_v33 }
 0x190   :  { %541 = vrsqrt.f32 %v246_v35 }
 0x191   :  { %v219_v36 = vpop.xlane.xlu1 %218  ;;  %v213_v37 = vpop.xlane.xlu0 %212 }
 0x192   :  { %v247_v39 = vadd.f32 1e-12, %v219_v36  ;;  %v244_v44 = vadd.f32 1e-12, %v213_v37 }
 0x194   :  { %543 = vrsqrt.f32 %v247_v39 }
 0x195   :  { %v235_v40 = vpop.xlane.xlu1 %234  ;;  %v229_v41 = vpop.xlane.xlu0 %228  ;;  %545 = vrsqrt.f32 %v254_v38 }
 0x196   :  { %v255_v42 = vadd.f32 1e-12, %v235_v40  ;;  %v252_v43 = vadd.f32 1e-12, %v229_v41 }
 0x198   :  { %547 = vrsqrt.f32 %v255_v42 }
 0x199   :  { %v231_v45 = vpop.xlane.xlu1 %230  ;;  %v215_v46 = vpop.xlane.xlu0 %214  ;;  %549 = vrsqrt.f32 %v252_v43 }
 0x19a   :  { %v253_v47 = vadd.f32 1e-12, %v231_v45  ;;  %v245_v48 = vadd.f32 1e-12, %v215_v46  ;;  %551 = vrsqrt.f32 %v244_v44 }
 0x19c   :  { %553 = vrsqrt.f32 %v253_v47 }
 0x19d   :  { %555 = vrsqrt.f32 %v245_v48  ;;  %v227_v49 = vpop.xlane.xlu1 %226  ;;  %v225_v50 = vpop.xlane.xlu0 %224 }
 0x19e   :  { %v251_v53 = vadd.f32 1e-12, %v227_v49  ;;  %v250_v54 = vadd.f32 1e-12, %v225_v50  ;;  %v542_v56 = vpop.eup %541 }
 0x19f   :  { %v278_v61 = vmul.f32 %v542_v56, %v675_v51 }
 0x1a0   :  { %557 = vrsqrt.f32 %v251_v53 }
 0x1a1   :  { %v544_v57 = vpop.eup %543  ;;  %559 = vrsqrt.f32 %v250_v54  ;;  %v223_v58 = vpop.xlane.xlu1 %222 }
 0x1a2   :  { %v221_v59 = vpop.xlane.xlu0 %220  ;;  %v279_v62 = vmul.f32 %v544_v57, %v685_v60  ;;  %v249_v1 = vadd.f32 1e-12, %v223_v58  ;;  %v546_v3 = vpop.eup %545 }
 0x1a3   :  { %v248_v2 = vadd.f32 1e-12, %v221_v59  ;;  %v286_v10 = vmul.f32 %v546_v3, %v677_v52 }
 0x1a4   :  { %v431_v4 = vpack.c.bf16 %v279_v62, %v278_v61  ;;  %561 = vrsqrt.f32 %v249_v1 }
 0x1a5   :  { %v548_v5 = vpop.eup %547  ;;  %563 = vrsqrt.f32 %v248_v2  ;;  %v239_v8 = vpop.xlane.xlu1 %238 }
 0x1a6   :  { %v237_v9 = vpop.xlane.xlu0 %236  ;;  %463 = vst [vmem:[#allocation7 + $0x8] sm:$0xff] %v431_v4   ;;  %v287_v11 = vmul.f32 %v548_v5, %v689_v0  ;;  %v257_v14 = vadd.f32 1e-12, %v239_v8  ;;  %v550_v16 = vpop.eup %549 }
 0x1a7   :  { %v256_v15 = vadd.f32 1e-12, %v237_v9  ;;  %v552_v51 = vpop.eup %551  ;;  %v284_v25 = vmul.f32 %v550_v16, %v687_v63 }
 0x1a8   :  { %v451_v17 = vpack.c.bf16 %v287_v11, %v286_v10  ;;  %565 = vrsqrt.f32 %v257_v14  ;;  %v276_v0 = vmul.f32 %v552_v51, %v679_v55 }
 0x1a9   :  { %v554_v60 = vpop.eup %553  ;;  %567 = vrsqrt.f32 %v256_v15  ;;  %v243_v20 = vpop.xlane.xlu1 %242 }
 0x1aa   :  { %v241_v21 = vpop.xlane.xlu0 %240  ;;  %v556_v22 = vpop.eup %555  ;;  %467 = vst [vmem:[#allocation7 + $0x28] sm:$0xff] %v451_v17   ;;  %v285_v26 = vmul.f32 %v554_v60, %v697_v7  ;;  %v259_v52 = vadd.f32 1e-12, %v243_v20 }
 0x1ab   :  { %v258_v29 = vadd.f32 1e-12, %v241_v21  ;;  %v277_v30 = vmul.f32 %v556_v22, %v695_v6 }
 0x1ac   :  { %v446_v31 = vpack.c.bf16 %v285_v26, %v284_v25  ;;  %569 = vrsqrt.f32 %v259_v52 }
 0x1ad   :  { %v558_v32 = vpop.eup %557  ;;  %v426_v33 = vpack.c.bf16 %v277_v30, %v276_v0  ;;  %571 = vrsqrt.f32 %v258_v29 }
 0x1ae   :  { %v560_v34 = vpop.eup %559  ;;  %466 = vst [vmem:[#allocation7 + $0x20] sm:$0xff] %v446_v31   ;;  %v283_v35 = vmul.f32 %v558_v32, %v705_v13 }
 0x1af   :  { %427 = vst [vmem:[#allocation7] sm:$0xff] %v426_v33   ;;  %v282_v63 = vmul.f32 %v560_v34, %v703_v12 }
 0x1b1   :  { %v562_v36 = vpop.eup %561  ;;  %v441_v7 = vpack.c.bf16 %v283_v35, %v282_v63 }
 0x1b2   :  { %v564_v37 = vpop.eup %563  ;;  %v281_v38 = vmul.f32 %v562_v36, %v713_v19 }
 0x1b3   :  { %465 = vst [vmem:[#allocation7 + $0x18] sm:$0xff] %v441_v7   ;;  %v280_v55 = vmul.f32 %v564_v37, %v711_v18 }
 0x1b5   :  { %v566_v6 = vpop.eup %565  ;;  %v436_v39 = vpack.c.bf16 %v281_v38, %v280_v55 }
 0x1b6   :  { %v568_v40 = vpop.eup %567  ;;  %v289_v41 = vmul.f32 %v566_v6, %v721_v24 }
 0x1b7   :  { %464 = vst [vmem:[#allocation7 + $0x10] sm:$0xff] %v436_v39   ;;  %v288_v42 = vmul.f32 %v568_v40, %v719_v23 }
 0x1b9   :  { %v570_v13 = vpop.eup %569  ;;  %v456_v43 = vpack.c.bf16 %v289_v41, %v288_v42 }
 0x1ba   :  { %v572_v12 = vpop.eup %571  ;;  %v291_v44 = vmul.f32 %v570_v13, %v729_v28 }
 0x1bb   :  { %468 = vst [vmem:[#allocation7 + $0x30] sm:$0xff] %v456_v43   ;;  %v290_v19 = vmul.f32 %v572_v12, %v727_v27 }
 0x1bd   :  { %v461_v18 = vpack.c.bf16 %v291_v44, %v290_v19 }
 0x1bf   :  { %469 = vst [vmem:[#allocation7 + $0x38] sm:$0xff] %v461_v18  }
 0x1c0   :  { %624 = shalt.err (!%p621_p0)
}
 0x1c1   :  { %s644_s26 = smov 64   ;;  %s645_s27 = smov 4  }
 0x1c2   :  { %383 = dma.vmem_to_hbm [thread:$0]  %s378_s24, 1024, %s761_s3, [#allocation4], %s644_s26, %s644_s26, %s645_s27  }
 0x1c3   :  { %637 = dma.done.wait [#allocation4], 1024  }
 0x1c4   :  { %638 = vsyncadd [#allocation4], 4294966272 }
 0x1c5   :  { %387 = vsyncpa [#allocation3], 1 }
 0x1c6   :  { %388 = vsyncpa [#allocation6], 1 }
 0x1c7   :  { %389 = vsyncpa [#allocation4], 1 }

</bundles_post_ra>
